<compile_context>
chip_gen: v5e
topology: v5e:2x2
jax: 0.10.0
libtpu: 0.0.40
codegen_flags: <defaults>
</compile_context>

<pallas_src>
import functools

import jax
import jax.numpy as jnp
from jax.experimental import pallas as pl
from jax.experimental.pallas import tpu as pltpu

MAP_IN = 450  # nn.Linear(450, hidden_size): fixed in-features of map_linear,
              # which pins the proj_q sequence length Lq == 450.


def _ceil_to(x, m):
    return ((x + m - 1) // m) * m


def _tpu_tuning():
    """Per-generation VMEM limit / per-grid-step byte budget / TensorCore count."""
    kind = ""
    try:
        kind = jax.devices()[0].device_kind.lower()
    except Exception:
        pass
    if "v7" in kind or "7x" in kind:
        # v7x: 64 MiB physical VMEM per TC, 2 TensorCores per chip.
        return dict(num_tc=2, vmem_limit=40 << 20, step_budget=28 << 20)
    if "v6" in kind:
        # v6e: 128 MiB physical VMEM, 1 TensorCore.
        return dict(num_tc=1, vmem_limit=96 << 20, step_budget=64 << 20)
    if "v5" in kind:
        # v5e: 128 MiB physical but only 16 MiB default scoped -> raise explicitly.
        return dict(num_tc=1, vmem_limit=64 << 20, step_budget=48 << 20)
    # Unknown chip: conservative defaults.
    return dict(num_tc=1, vmem_limit=32 << 20, step_budget=24 << 20)


def _step_vmem_bytes(tile_b, lp, h, lq_pad, flat_out, in_bytes=2):
    """Rough per-grid-step VMEM footprint: double-buffered BlockSpec tiles plus
    the compiler-internal f32 intermediates that no BlockSpec covers."""
    lane = 128
    sub = 8 * (4 // in_bytes)                               # bf16 packs 16 sublanes
    q = tile_b * _ceil_to(h, sub) * _ceil_to(lq_pad, lane) * in_bytes   # (tb,H,Lq)
    p = tile_b * _ceil_to(lp, sub) * _ceil_to(h, lane) * in_bytes       # (tb,Lp,H)
    if flat_out:
        o = _ceil_to(tile_b, 8) * _ceil_to(lp * h, lane) * 4            # (tb,Lp*H) f32
    else:
        o = tile_b * _ceil_to(lp, 8) * _ceil_to(h, lane) * 4            # (tb,Lp,H) f32
    att = tile_b * _ceil_to(lp, 8) * _ceil_to(lq_pad, lane) * 4         # f32 att
    mm2 = _ceil_to(tile_b * lp, 8) * _ceil_to(h, lane) * 4              # f32 matmul-2
    wm = _ceil_to(lq_pad, sub) * _ceil_to(h, lane) * in_bytes           # single buffer
    return 2 * (q + p + o) + att + mm2 + wm


def _pick_tile_b(batch, lp, h, lq_pad, num_tc, budget, flat_out):
    divisors = [d for d in range(1, batch + 1) if batch % d == 0]
    fits = [d for d in divisors
            if _step_vmem_bytes(d, lp, h, lq_pad, flat_out) <= budget]
    if not fits:
        # TODO(synk): at production shapes where even tile_b=1 overflows the
        # budget, block Lq (reduction grid axis + f32 VMEM accumulator with
        # pl.when init/finalize) instead of relying on spills.
        fits = [1]
    if num_tc > 1:
        # Keep the grid length a multiple of num_tc (no TensorCore idles on a
        # tail step) and prefer >= 2 steps per core so the pipeline can hide
        # the q_t DMA.
        for min_steps in (2 * num_tc, num_tc):
            cands = [d for d in fits
                     if (batch // d) % num_tc == 0 and (batch // d) >= min_steps]
            if cands:
                return max(cands)
        cands = [d for d in fits if (batch // d) >= num_tc]
        if cands:
            return max(cands)
    # Single TensorCore: fewest grid steps (each step costs ~0.35 us fixed).
    return max(fits)


def dot_match_kernel(p_ref, qt_ref, wmt_ref, bm_ref, out_ref, *, flat_out):
    p = p_ref[...]                                   # (TB, Lp, H)       bf16
    qt = qt_ref[...]                                 # (TB, H, Lq_pad)   bf16
    tb, lp, h = p.shape
    lqp = qt.shape[2]

    # att_weights = proj_p @ proj_q^T, f32 accumulation on the MXU.
    att = jnp.einsum("bph,bhq->bpq", p, qt,
                     preferred_element_type=jnp.float32)     # (TB, Lp, Lq_pad) f32

    # map_linear fused across the whole batch tile: (TB*Lp, Lq_pad)@(Lq_pad, H).
    # att is fed to the MXU in bf16; accumulation stays f32.  The zero K-pad
    # rows of wmt contribute nothing.
    out = jax.lax.dot_general(
        att.astype(qt.dtype).reshape(tb * lp, lqp), wmt_ref[...],
        (((1,), (0,)), ((), ())),
        preferred_element_type=jnp.float32)                  # (TB*Lp, H) f32

    # f32 epilogue (bias + ReLU): v5e's VPU has no bf16 path.
    out = jnp.maximum(out + bm_ref[...], 0.0)

    if flat_out:
        out_ref[...] = out.reshape(tb, lp * h).astype(out_ref.dtype)
    else:
        out_ref[...] = out.reshape(tb, lp, h).astype(out_ref.dtype)
    # TODO(synk): if the production model has Lp > ~H/2, reassociate to
    # P @ (Q^T @ Wm^T): fewer FLOPs and no (Lp, Lq) intermediate (changes the
    # FP summation order, so gate it on the real shapes).


def dot_match_net(proj_p, proj_q, seq_len, params, *, tile_b=None,
                  compute_dtype=jnp.bfloat16):
    """ReLU(map_linear(proj_p @ proj_q^T)); the trans_linear branch is dead."""
    del seq_len  # accepted for API parity with the PyTorch module; unused there too
    B, Lp, H = proj_p.shape
    _, Lq, _ = proj_q.shape
    assert Lq == MAP_IN, f"proj_q seq len must be {MAP_IN} to match map_linear"

    cfg = _tpu_tuning()
    Lq_pad = _ceil_to(Lq, 128)          # 450 -> 512; free in VMEM, aligns DMAs

    # One-pass layout/dtype hoists (transpose + cast + zero-pad fuse in XLA).
    # TODO(synk): have the upstream projection emit proj_q as (B, H, Lq) bf16
    # directly so this transpose pass disappears from HBM traffic entirely.
    p16 = proj_p.astype(compute_dtype)
    q_t = jnp.pad(jnp.swapaxes(proj_q, 1, 2).astype(compute_dtype),
                  ((0, 0), (0, 0), (0, Lq_pad - Lq)))
    wm_t = jnp.pad(jnp.swapaxes(params["wm"], 0, 1).astype(compute_dtype),
                   ((0, Lq_pad - Lq), (0, 0)))       # zero K-pad rows => exact
    bm = params["bm"].reshape(1, H).astype(jnp.float32)
    # trans_linear (wt/bt) feeds only the dead trans_q branch; never used.

    # Lane-dense output pays off only while H itself is not lane-aligned.
    flat_out = (H % 128 != 0) and ((Lp * H) % 128 == 0)

    if tile_b is None:
        tile_b = _pick_tile_b(B, Lp, H, Lq_pad, cfg["num_tc"],
                              cfg["step_budget"], flat_out)
    tile_b = max(1, min(tile_b, B))
    while B % tile_b:                    # only needed for user-supplied tile_b
        tile_b -= 1
    grid = (B // tile_b,)

    # A 2-D flat output block needs its sublane dim full or 8-aligned.
    if flat_out and not (tile_b == B or tile_b % 8 == 0):
        flat_out = False

    def build(use_flat, single_buffer_weights):
        kern = functools.partial(dot_match_kernel, flat_out=use_flat)
        inv = (dict(pipeline_mode=pl.Buffered(1))
               if single_buffer_weights else {})
        if use_flat:
            out_shape = jax.ShapeDtypeStruct((B, Lp * H), proj_p.dtype)
            out_spec = pl.BlockSpec((tile_b, Lp * H), lambda b: (b, 0))
        else:
            out_shape = jax.ShapeDtypeStruct((B, Lp, H), proj_p.dtype)
            out_spec = pl.BlockSpec((tile_b, Lp, H), lambda b: (b, 0, 0))
        return pl.pallas_call(
            kern,
            out_shape=out_shape,
            grid_spec=pltpu.PrefetchScalarGridSpec(
                num_scalar_prefetch=0,
                grid=grid,
                in_specs=[
                    pl.BlockSpec((tile_b, Lp, H), lambda b: (b, 0, 0)),      # proj_p
                    pl.BlockSpec((tile_b, H, Lq_pad), lambda b: (b, 0, 0)),  # proj_q^T
                    pl.BlockSpec((Lq_pad, H), lambda b: (0, 0), **inv),      # W_map^T
                    pl.BlockSpec((1, H), lambda b: (0, 0), **inv),           # b_map
                ],
                out_specs=out_spec,
            ),
            compiler_params=pltpu.CompilerParams(
                dimension_semantics=("parallel",),
                vmem_limit_bytes=cfg["vmem_limit"]),
        )

    try:
        out = build(flat_out, True)(p16, q_t, wm_t, bm)
        used_flat = flat_out
    except Exception:
        # Fallback for jax/Mosaic versions that reject pl.Buffered(1) on a
        # grid-invariant operand or the in-kernel (TB*Lp,H)->(TB,Lp*H) merge:
        # proven 3-D-output, double-buffered configuration.
        out = build(False, False)(p16, q_t, wm_t, bm)
        used_flat = False

    if used_flat:
        out = out.reshape(B, Lp, H)      # free trailing-dim split outside kernel
    return out


def reference(proj_p, proj_q, params, compute_dtype=jnp.float32):
    """Pure-JAX reference at a chosen operand precision (f32 accumulation)."""
    p = proj_p.astype(compute_dtype)
    q = proj_q.astype(compute_dtype)
    wm = params["wm"].astype(compute_dtype)
    att = jnp.einsum("bpd,bqd->bpq", p, q,
                     preferred_element_type=jnp.float32).astype(compute_dtype)
    out = jnp.einsum("bpq,hq->bph", att, wm,
                     preferred_element_type=jnp.float32) + params["bm"][0]
    return jnp.maximum(out, 0.0)


if __name__ == "__main__":
    B, Lp, Lq, H = 2, 8, MAP_IN, 32   # hidden_size = 32

    key = jax.random.PRNGKey(0)
    kp, kq, kwt, kbt, kwm, kbm = jax.random.split(key, 6)

    proj_p = jax.random.normal(kp, (B, Lp, H), dtype=jnp.float32)
    proj_q = jax.random.normal(kq, (B, Lq, H), dtype=jnp.float32) * 0.1
    seq_len = jnp.full((B,), Lq, dtype=jnp.int32)

    params = {
        # PyTorch Linear weight layout: (out_features, in_features)
        "wt": jax.random.normal(kwt, (H, H), dtype=jnp.float32) * 0.05,   # dead path
        "bt": jax.random.normal(kbt, (1, H), dtype=jnp.float32) * 0.05,   # dead path
        "wm": jax.random.normal(kwm, (H, MAP_IN), dtype=jnp.float32) * 0.05,
        "bm": jax.random.normal(kbm, (1, H), dtype=jnp.float32) * 0.05,
    }

    out = jax.block_until_ready(dot_match_net(proj_p, proj_q, seq_len, params))
    assert out.shape == (B, Lp, H)

    # Matching-precision reference (bf16 operands, f32 accumulation) ...
    ref_bf16 = reference(proj_p, proj_q, params, compute_dtype=jnp.bfloat16)
    assert jnp.allclose(out, ref_bf16, atol=5e-3, rtol=5e-3), \
        "mismatch vs matched-precision (bf16) reference"
    # ... plus a loose sanity check against the pure-f32 reference.
    ref_f32 = reference(proj_p, proj_q, params, compute_dtype=jnp.float32)
    assert jnp.allclose(out, ref_f32, atol=5e-2, rtol=5e-2), \
        "mismatch vs f32 reference"

    print("KERNEL_OK")
</pallas_src>

<mosaic_0001>
module attributes {stable_mosaic.version = 11 : i64} {
  func.func @dot_match_kernel(%arg0: i32, %arg1: memref<2x8x32xbf16, #tpu.memory_space<vmem>>, %arg2: memref<2x32x512xbf16, #tpu.memory_space<vmem>>, %arg3: memref<512x32xbf16, #tpu.memory_space<vmem>>, %arg4: memref<1x32xf32, #tpu.memory_space<vmem>>, %arg5: memref<2x256xf32, #tpu.memory_space<vmem>>) attributes {dimension_semantics = [#tpu.dimension_semantics<parallel>], iteration_bounds = array<i64: 1>, scalar_prefetch = 0 : i64, scratch_operands = 0 : i64, tpu.core_type = #tpu.core_type<tc>, window_params = [{transform_indices = @transform_0, window_bounds = array<i64: 2, 8, 32>}, {transform_indices = @transform_1, window_bounds = array<i64: 2, 32, 512>}, {pipeline_mode = #tpu.pipeline_mode<synchronous>, transform_indices = @transform_2, window_bounds = array<i64: 512, 32>}, {pipeline_mode = #tpu.pipeline_mode<synchronous>, transform_indices = @transform_3, window_bounds = array<i64: 1, 32>}, {transform_indices = @transform_4, window_bounds = array<i64: 2, 256>}]} {
    %c0 = arith.constant 0 : index
    %c0_0 = arith.constant 0 : index
    %c0_1 = arith.constant 0 : index
    %0 = vector.load %arg1[%c0, %c0_0, %c0_1] : memref<2x8x32xbf16, #tpu.memory_space<vmem>>, vector<2x8x32xbf16>
    %c0_2 = arith.constant 0 : index
    %c0_3 = arith.constant 0 : index
    %c0_4 = arith.constant 0 : index
    %1 = vector.load %arg2[%c0_2, %c0_3, %c0_4] : memref<2x32x512xbf16, #tpu.memory_space<vmem>>, vector<2x32x512xbf16>
    "tpu.trace_start"() <{level = 10 : i32, message = "bph,bhq->bpq"}> : () -> ()
    %cst = arith.constant dense<0.000000e+00> : vector<2x8x512xf32>
    %2 = tpu.matmul %0, %1, %cst {dimension_numbers = #tpu.dot_dimension_numbers<[2], [1], [1], [2], [0, 0, 0, 1, 1, 2], [0], [0]>} : vector<2x8x32xbf16>, vector<2x32x512xbf16>, vector<2x8x512xf32> -> vector<2x8x512xf32>
    "tpu.trace_stop"() : () -> ()
    %3 = arith.truncf %2 : vector<2x8x512xf32> to vector<2x8x512xbf16>
    %4 = vector.shape_cast %3 : vector<2x8x512xbf16> to vector<16x512xbf16>
    %c0_5 = arith.constant 0 : index
    %c0_6 = arith.constant 0 : index
    %5 = vector.load %arg3[%c0_5, %c0_6] : memref<512x32xbf16, #tpu.memory_space<vmem>>, vector<512x32xbf16>
    %cst_7 = arith.constant dense<0.000000e+00> : vector<16x32xf32>
    %6 = tpu.matmul %4, %5, %cst_7 {dimension_numbers = #tpu.dot_dimension_numbers<[1], [0], [0], [1], [0, 0, 1, 1], [], []>} : vector<16x512xbf16>, vector<512x32xbf16>, vector<16x32xf32> -> vector<16x32xf32>
    %c0_8 = arith.constant 0 : index
    %c0_9 = arith.constant 0 : index
    %7 = vector.load %arg4[%c0_8, %c0_9] : memref<1x32xf32, #tpu.memory_space<vmem>>, vector<1x32xf32>
    %8 = vector.broadcast %7 : vector<1x32xf32> to vector<16x32xf32>
    %9 = arith.addf %6, %8 : vector<16x32xf32>
    %cst_10 = arith.constant 0.000000e+00 : f32
    %10 = vector.broadcast %cst_10 : f32 to vector<16x32xf32>
    %11 = arith.maximumf %9, %10 : vector<16x32xf32>
    %12 = vector.shape_cast %11 : vector<16x32xf32> to vector<2x256xf32>
    %c0_11 = arith.constant 0 : index
    %c0_12 = arith.constant 0 : index
    %13 = vector.load %arg5[%c0_11, %c0_12] : memref<2x256xf32, #tpu.memory_space<vmem>>, vector<2x256xf32>
    tpu.vector_store %arg5[%c0_11, %c0_12], %12 {strides = array<i32>} : memref<2x256xf32, #tpu.memory_space<vmem>>, vector<2x256xf32>,
    return
  }
  func.func @transform_0(%arg0: i32) -> (i32, i32, i32) {
    %c0_i32 = arith.constant 0 : i32
    %c0_i32_0 = arith.constant 0 : i32
    %c0_i32_1 = arith.constant 0 : i32
    return %arg0, %c0_i32, %c0_i32_0 : i32, i32, i32
  }
  func.func @transform_1(%arg0: i32) -> (i32, i32, i32) {
    %c0_i32 = arith.constant 0 : i32
    %c0_i32_0 = arith.constant 0 : i32
    %c0_i32_1 = arith.constant 0 : i32
    return %arg0, %c0_i32, %c0_i32_0 : i32, i32, i32
  }
  func.func @transform_2(%arg0: i32) -> (i32, i32) {
    %c0_i32 = arith.constant 0 : i32
    %c0_i32_0 = arith.constant 0 : i32
    %c0_i32_1 = arith.constant 0 : i32
    return %c0_i32, %c0_i32_0 : i32, i32
  }
  func.func @transform_3(%arg0: i32) -> (i32, i32) {
    %c0_i32 = arith.constant 0 : i32
    %c0_i32_0 = arith.constant 0 : i32
    %c0_i32_1 = arith.constant 0 : i32
    return %c0_i32, %c0_i32_0 : i32, i32
  }
  func.func @transform_4(%arg0: i32) -> (i32, i32) {
    %c0_i32 = arith.constant 0 : i32
    %c0_i32_0 = arith.constant 0 : i32
    return %arg0, %c0_i32 : i32, i32
  }
}

module attributes {stable_mosaic.version = 11 : i64} {
  func.func @dot_match_kernel(%arg0: i32, %arg1: memref<2x8x32xbf16, #tpu.memory_space<vmem>>, %arg2: memref<2x32x512xbf16, #tpu.memory_space<vmem>>, %arg3: memref<512x32xbf16, #tpu.memory_space<vmem>>, %arg4: memref<1x32xf32, #tpu.memory_space<vmem>>, %arg5: memref<2x8x32xf32, #tpu.memory_space<vmem>>) attributes {dimension_semantics = [#tpu.dimension_semantics<parallel>], iteration_bounds = array<i64: 1>, scalar_prefetch = 0 : i64, scratch_operands = 0 : i64, tpu.core_type = #tpu.core_type<tc>, window_params = [{transform_indices = @transform_0, window_bounds = array<i64: 2, 8, 32>}, {transform_indices = @transform_1, window_bounds = array<i64: 2, 32, 512>}, {pipeline_mode = #tpu.pipeline_mode<synchronous>, transform_indices = @transform_2, window_bounds = array<i64: 512, 32>}, {pipeline_mode = #tpu.pipeline_mode<synchronous>, transform_indices = @transform_3, window_bounds = array<i64: 1, 32>}, {transform_indices = @transform_4, window_bounds = array<i64: 2, 8, 32>}]} {
    %c0 = arith.constant 0 : index
    %c0_0 = arith.constant 0 : index
    %c0_1 = arith.constant 0 : index
    %0 = vector.load %arg1[%c0, %c0_0, %c0_1] : memref<2x8x32xbf16, #tpu.memory_space<vmem>>, vector<2x8x32xbf16>
    %c0_2 = arith.constant 0 : index
    %c0_3 = arith.constant 0 : index
    %c0_4 = arith.constant 0 : index
    %1 = vector.load %arg2[%c0_2, %c0_3, %c0_4] : memref<2x32x512xbf16, #tpu.memory_space<vmem>>, vector<2x32x512xbf16>
    "tpu.trace_start"() <{level = 10 : i32, message = "bph,bhq->bpq"}> : () -> ()
    %cst = arith.constant dense<0.000000e+00> : vector<2x8x512xf32>
    %2 = tpu.matmul %0, %1, %cst {dimension_numbers = #tpu.dot_dimension_numbers<[2], [1], [1], [2], [0, 0, 0, 1, 1, 2], [0], [0]>} : vector<2x8x32xbf16>, vector<2x32x512xbf16>, vector<2x8x512xf32> -> vector<2x8x512xf32>
    "tpu.trace_stop"() : () -> ()
    %3 = arith.truncf %2 : vector<2x8x512xf32> to vector<2x8x512xbf16>
    %4 = vector.shape_cast %3 : vector<2x8x512xbf16> to vector<16x512xbf16>
    %c0_5 = arith.constant 0 : index
    %c0_6 = arith.constant 0 : index
    %5 = vector.load %arg3[%c0_5, %c0_6] : memref<512x32xbf16, #tpu.memory_space<vmem>>, vector<512x32xbf16>
    %cst_7 = arith.constant dense<0.000000e+00> : vector<16x32xf32>
    %6 = tpu.matmul %4, %5, %cst_7 {dimension_numbers = #tpu.dot_dimension_numbers<[1], [0], [0], [1], [0, 0, 1, 1], [], []>} : vector<16x512xbf16>, vector<512x32xbf16>, vector<16x32xf32> -> vector<16x32xf32>
    %c0_8 = arith.constant 0 : index
    %c0_9 = arith.constant 0 : index
    %7 = vector.load %arg4[%c0_8, %c0_9] : memref<1x32xf32, #tpu.memory_space<vmem>>, vector<1x32xf32>
    %8 = vector.broadcast %7 : vector<1x32xf32> to vector<16x32xf32>
    %9 = arith.addf %6, %8 : vector<16x32xf32>
    %cst_10 = arith.constant 0.000000e+00 : f32
    %10 = vector.broadcast %cst_10 : f32 to vector<16x32xf32>
    %11 = arith.maximumf %9, %10 : vector<16x32xf32>
    %12 = vector.shape_cast %11 : vector<16x32xf32> to vector<2x8x32xf32>
    %c0_11 = arith.constant 0 : index
    %c0_12 = arith.constant 0 : index
    %c0_13 = arith.constant 0 : index
    %13 = vector.load %arg5[%c0_11, %c0_12, %c0_13] : memref<2x8x32xf32, #tpu.memory_space<vmem>>, vector<2x8x32xf32>
    tpu.vector_store %arg5[%c0_11, %c0_12, %c0_13], %12 {strides = array<i32>} : memref<2x8x32xf32, #tpu.memory_space<vmem>>, vector<2x8x32xf32>,
    return
  }
  func.func @transform_0(%arg0: i32) -> (i32, i32, i32) {
    %c0_i32 = arith.constant 0 : i32
    %c0_i32_0 = arith.constant 0 : i32
    %c0_i32_1 = arith.constant 0 : i32
    return %arg0, %c0_i32, %c0_i32_0 : i32, i32, i32
  }
  func.func @transform_1(%arg0: i32) -> (i32, i32, i32) {
    %c0_i32 = arith.constant 0 : i32
    %c0_i32_0 = arith.constant 0 : i32
    %c0_i32_1 = arith.constant 0 : i32
    return %arg0, %c0_i32, %c0_i32_0 : i32, i32, i32
  }
  func.func @transform_2(%arg0: i32) -> (i32, i32) {
    %c0_i32 = arith.constant 0 : i32
    %c0_i32_0 = arith.constant 0 : i32
    %c0_i32_1 = arith.constant 0 : i32
    return %c0_i32, %c0_i32_0 : i32, i32
  }
  func.func @transform_3(%arg0: i32) -> (i32, i32) {
    %c0_i32 = arith.constant 0 : i32
    %c0_i32_0 = arith.constant 0 : i32
    %c0_i32_1 = arith.constant 0 : i32
    return %c0_i32, %c0_i32_0 : i32, i32
  }
  func.func @transform_4(%arg0: i32) -> (i32, i32, i32) {
    %c0_i32 = arith.constant 0 : i32
    %c0_i32_0 = arith.constant 0 : i32
    %c0_i32_1 = arith.constant 0 : i32
    return %arg0, %c0_i32, %c0_i32_0 : i32, i32, i32
  }
}

</mosaic_0001>

<bundles_post_ra>
// kernel: tpu_custom_call.1
= control target key start
LH: loop header
LB: loop body
LE: loop exit
PB: predicated region body
PF: predicated region fallthrough
CT: control target
= control target key end

     0   :  { %vm77_vm0 = vcmask 261120   ;;  %s1110_s0 = inlined_call_operand.vmem [shape: bf16[2,8,32], index: 0, kind: input, shape index: {}]   ;;  %s1111_s1 = inlined_call_operand.vmem [shape: bf16[2,32,512], index: 1, kind: input, shape index: {}]   ;;  %s1112_s2 = inlined_call_operand.vmem [shape: bf16[512,32], index: 2, kind: input, shape index: {}]   ;;  %s1113_s3 = inlined_call_operand.vmem [shape: f32[1,32], index: 3, kind: input, shape index: {}]   ;;  %s1114_s4 = inlined_call_operand.hbm [shape: f32[2,8,32], index: 4, kind: output, shape index: {}]  }
   0x1   :  { %v608_v0 = vld [vmem:[%s1111_s1 + $0x20] sm:$0xf]  ;;  %v796_v1 = vld [vmem:[%s1111_s1 + $0x2c] sm:$0xf0]  ;;  %v794_v2 = vld [vmem:[%s1111_s1 + $0x24] sm:$0xf] }
   0x2   :  { %v609_v3 = vor.u32 %v796_v1, %v608_v0  ;;  %v610_v4 = vld [vmem:[%s1111_s1 + $0x30] sm:$0xf0]  ;;  %v616_v5 = vld [vmem:[%s1111_s1 + $0x28] sm:$0xf]  ;;  %v797_v6 = vld [vmem:[%s1111_s1 + $0x34] sm:$0xf0] }
   0x3   :  { %v613_v7 = vor.u32 %v794_v2, %v610_v4  ;;  %v617_v8 = vor.u32 %v797_v6, %v616_v5  ;;  %v795_v9 = vld [vmem:[%s1111_s1 + $0x2c] sm:$0xf]  ;;  %v618_v10 = vld [vmem:[%s1111_s1 + $0x38] sm:$0xf0]  ;;  %v592_v11 = vld [vmem:[%s1111_s1] sm:$0xf] }
   0x4   :  { %87 = vmatpush.bf16.msra.mxu0 %v609_v3  ;;  %v621_v12 = vor.u32 %v795_v9, %v618_v10  ;;  %v792_v13 = vld [vmem:[%s1111_s1 + $0xc] sm:$0xf0]  ;;  %v790_v14 = vld [vmem:[%s1111_s1 + $0x4] sm:$0xf]  ;;  %v594_v15 = vld [vmem:[%s1111_s1 + $0x10] sm:$0xf0] }
   0x5   :  { %100 = vmatpush.bf16.msra.mxu1 %v613_v7  ;;  %113 = vmatpush.bf16.msra.mxu2 %v617_v8  ;;  %v593_v16 = vor.u32 %v792_v13, %v592_v11  ;;  %v597_v17 = vor.u32 %v790_v14, %v594_v15  ;;  %v600_v18 = vld [vmem:[%s1111_s1 + $0x8] sm:$0xf]  ;;  %v793_v19 = vld [vmem:[%s1111_s1 + $0x14] sm:$0xf0]  ;;  %v791_v20 = vld [vmem:[%s1111_s1 + $0xc] sm:$0xf] }
   0x6   :  { %126 = vmatpush.bf16.msra.mxu3 %v621_v12  ;;  %v601_v21 = vor.u32 %v793_v19, %v600_v18  ;;  %v602_v22 = vld [vmem:[%s1111_s1 + $0x18] sm:$0xf0]  ;;  %v19_v23 = vld [vmem:[%s1110_s0] sm:$0xf]  ;;  %v652_v25 = vld [vmem:[%s1111_s1 + $0x68] sm:$0xf] }
   0x7   :  { %v605_v24 = vor.u32 %v791_v20, %v602_v22  ;;  %v805_v26 = vld [vmem:[%s1111_s1 + $0x74] sm:$0xf0]  ;;  %v803_v27 = vld [vmem:[%s1111_s1 + $0x6c] sm:$0xf]  ;;  %v654_v29 = vld [vmem:[%s1111_s1 + $0x78] sm:$0xf0] }
   0x8   :  { %88 = vmatpush.bf16.msra.mxu0 %v593_v16  ;;  %v653_v28 = vor.u32 %v805_v26, %v652_v25  ;;  %v644_v30 = vld [vmem:[%s1111_s1 + $0x60] sm:$0xf]  ;;  %v804_v31 = vld [vmem:[%s1111_s1 + $0x6c] sm:$0xf0]  ;;  %v657_v32 = vor.u32 %v803_v27, %v654_v29  ;;  %v802_v34 = vld [vmem:[%s1111_s1 + $0x64] sm:$0xf] }
   0x9   :  { %101 = vmatpush.bf16.msra.mxu1 %v597_v17  ;;  %114 = vmatpush.bf16.msra.mxu2 %v601_v21  ;;  %v645_v33 = vor.u32 %v804_v31, %v644_v30  ;;  %v646_v35 = vld [vmem:[%s1111_s1 + $0x70] sm:$0xf0]  ;;  %v636_v36 = vld [vmem:[%s1111_s1 + $0x48] sm:$0xf]  ;;  %v801_v38 = vld [vmem:[%s1111_s1 + $0x54] sm:$0xf0] }
   0xa   :  { %127 = vmatpush.bf16.msra.mxu3 %v605_v24  ;;  %v649_v37 = vor.u32 %v802_v34, %v646_v35  ;;  %v799_v39 = vld [vmem:[%s1111_s1 + $0x4c] sm:$0xf]  ;;  %v638_v40 = vld [vmem:[%s1111_s1 + $0x58] sm:$0xf0]  ;;  %v637_v41 = vor.u32 %v801_v38, %v636_v36  ;;  %v628_v43 = vld [vmem:[%s1111_s1 + $0x40] sm:$0xf] }
   0xb   :  { %622 = vmatmul.msk.bf16.vlgmr.msra.gmra.mxu0 %vm77_vm0, %v19_v23  ;;  %v641_v42 = vor.u32 %v799_v39, %v638_v40  ;;  %v800_v44 = vld [vmem:[%s1111_s1 + $0x4c] sm:$0xf0]  ;;  %v798_v45 = vld [vmem:[%s1111_s1 + $0x44] sm:$0xf]  ;;  %v630_v46 = vld [vmem:[%s1111_s1 + $0x50] sm:$0xf0] }
   0xc   :  { %623 = vmatmul.msk.bf16.vlgmr.msra.gmra.mxu1 %vm77_vm0, %v19_v23  ;;  %624 = vmatmul.msk.bf16.vlgmr.msra.gmra.mxu2 %vm77_vm0, %v19_v23  ;;  %v629_v47 = vor.u32 %v800_v44, %v628_v43  ;;  %v813_v48 = vld [vmem:[%s1112_s2 + $0x38] sm:$0xff]  ;;  %v633_v50 = vor.u32 %v798_v45, %v630_v46 }
   0xd   :  { %208 = vmatpush.bf16.msrb.mxu2 %v653_v28  ;;  %625 = vmatmul.msk.bf16.vlgmr.msra.gmra.mxu3 %vm77_vm0, %v19_v23  ;;  %v829_v49 = vld [vmem:[%s1112_s2 + $0xb8] sm:$0xff] }
   0xe   :  { %221 = vmatpush.bf16.msrb.mxu3 %v657_v32  ;;  %182 = vmatpush.bf16.msrb.mxu0 %v645_v33  ;;  %v837_v51 = vld [vmem:[%s1112_s2 + $0xf8] sm:$0xff] }
   0xf   :  { %195 = vmatpush.bf16.msrb.mxu1 %v649_v37 }
  0x11   :  { %209 = vmatpush.bf16.msrb.mxu2 %v637_v41 }
  0x12   :  { %9 = vsyncpa [#allocation3], 0  ;;  %222 = vmatpush.bf16.msrb.mxu3 %v641_v42  ;;  %v821_v52 = vld [vmem:[%s1112_s2 + $0x78] sm:$0xff]  ;;  %183 = vmatpush.bf16.msrb.mxu0 %v629_v47  ;;  %v812_v53 = vld [vmem:[%s1112_s2 + $0x30] sm:$0xff]  ;;  %s868_s13 = smov [#allocation2]   ;;  %s578_s16 = sshll.u32 %s1114_s4, 4  ;;  %s579_s16 = int_to_ptr.hbm [resolvable:$true] %s578_s16 }
  0x13   :  { %196 = vmatpush.bf16.msrb.mxu1 %v633_v50  ;;  %v820_v54 = vld [vmem:[%s1112_s2 + $0x70] sm:$0xff]  ;;  %v20_v55 = vld [vmem:[%s1110_s0 + $0x4] sm:$0xf]  ;;  %v811_v56 = vld [vmem:[%s1112_s2 + $0x28] sm:$0xff]  ;;  %s576_s14 = sshll.u32 %s868_s13, 4  ;;  %s869_s17 = smov 128   ;;  %s577_s14 = int_to_ptr.vmem [resolvable:$true] %s576_s14 }
  0x14   :  { %v819_v57 = vld [vmem:[%s1112_s2 + $0x68] sm:$0xff]  ;;  %v828_v58 = vld [vmem:[%s1112_s2 + $0xb0] sm:$0xff]  ;;  %v810_v60 = vld [vmem:[%s1112_s2 + $0x20] sm:$0xff]  ;;  %s870_s18 = smov 8  }
  0x15   :  { %540 = vmatpush.bf16.msra.mxu2 %v829_v49  ;;  %v836_v59 = vld [vmem:[%s1112_s2 + $0xf0] sm:$0xff]  ;;  %v818_v61 = vld [vmem:[%s1112_s2 + $0x60] sm:$0xff]  ;;  %v827_v62 = vld [vmem:[%s1112_s2 + $0xa8] sm:$0xff] }
  0x16   :  { %554 = vmatpush.bf16.msra.mxu3 %v837_v51  ;;  %512 = vmatpush.bf16.msra.mxu0 %v813_v48  ;;  %v835_v63 = vld [vmem:[%s1112_s2 + $0xe8] sm:$0xff]  ;;  %v809_v0 = vld [vmem:[%s1112_s2 + $0x18] sm:$0xff]  ;;  %v826_v2 = vld [vmem:[%s1112_s2 + $0xa0] sm:$0xff] }
  0x17   :  { %526 = vmatpush.bf16.msra.mxu1 %v821_v52  ;;  %v817_v1 = vld [vmem:[%s1112_s2 + $0x58] sm:$0xff]  ;;  %v834_v3 = vld [vmem:[%s1112_s2 + $0xe0] sm:$0xff]  ;;  %v808_v4 = vld [vmem:[%s1112_s2 + $0x10] sm:$0xff] }
  0x18   :  { %v816_v5 = vld [vmem:[%s1112_s2 + $0x50] sm:$0xff]  ;;  %v825_v6 = vld [vmem:[%s1112_s2 + $0x98] sm:$0xff]  ;;  %v807_v8 = vld [vmem:[%s1112_s2 + $0x8] sm:$0xff] }
  0x19   :  { %541 = vmatpush.bf16.msra.mxu2 %v828_v58  ;;  %v833_v7 = vld [vmem:[%s1112_s2 + $0xd8] sm:$0xff]  ;;  %v815_v9 = vld [vmem:[%s1112_s2 + $0x48] sm:$0xff]  ;;  %v824_v10 = vld [vmem:[%s1112_s2 + $0x90] sm:$0xff] }
  0x1a   :  { %513 = vmatpush.bf16.msra.mxu0 %v812_v53  ;;  %555 = vmatpush.bf16.msra.mxu3 %v836_v59  ;;  %v832_v11 = vld [vmem:[%s1112_s2 + $0xd0] sm:$0xff]  ;;  %v806_v12 = vld [vmem:[%s1112_s2] sm:$0xff]  ;;  %v823_v14 = vld [vmem:[%s1112_s2 + $0x88] sm:$0xff] }
  0x1b   :  { %527 = vmatpush.bf16.msra.mxu1 %v820_v54  ;;  %658 = vmatmul.msk.bf16.vlgmr.msrb.gmra.mxu0 %vm77_vm0, %v20_v55  ;;  %v814_v13 = vld [vmem:[%s1112_s2 + $0x40] sm:$0xff]  ;;  %v831_v15 = vld [vmem:[%s1112_s2 + $0xc8] sm:$0xff] }
  0x1c   :  { %659 = vmatmul.msk.bf16.vlgmr.msrb.gmra.mxu1 %vm77_vm0, %v20_v55  ;;  %660 = vmatmul.msk.bf16.vlgmr.msrb.gmra.mxu2 %vm77_vm0, %v20_v55  ;;  %v822_v16 = vld [vmem:[%s1112_s2 + $0x80] sm:$0xff] }
  0x1d   :  { %661 = vmatmul.msk.bf16.vlgmr.msrb.gmra.mxu3 %vm77_vm0, %v20_v55  ;;  %542 = vmatpush.bf16.msra.mxu2 %v827_v62  ;;  %v830_v17 = vld [vmem:[%s1112_s2 + $0xc0] sm:$0xff] }
  0x1e   :  { %514 = vmatpush.bf16.msra.mxu0 %v811_v56  ;;  %556 = vmatpush.bf16.msra.mxu3 %v835_v63  ;;  %v841_v51 = vld [vmem:[%s1113_s3] ss:$0 sm:$0xff] }
  0x1f   :  { %528 = vmatpush.bf16.msra.mxu1 %v819_v57 }
  0x21   :  { %543 = vmatpush.bf16.msra.mxu2 %v826_v2 }
  0x22   :  { %515 = vmatpush.bf16.msra.mxu0 %v810_v60  ;;  %557 = vmatpush.bf16.msra.mxu3 %v834_v3 }
  0x23   :  { %529 = vmatpush.bf16.msra.mxu1 %v818_v61 }
  0x25   :  { %544 = vmatpush.bf16.msra.mxu2 %v825_v6 }
  0x26   :  { %516 = vmatpush.bf16.msra.mxu0 %v809_v0  ;;  %558 = vmatpush.bf16.msra.mxu3 %v833_v7 }
  0x27   :  { %530 = vmatpush.bf16.msra.mxu1 %v817_v1 }
  0x29   :  { %545 = vmatpush.bf16.msra.mxu2 %v824_v10 }
  0x2a   :  { %517 = vmatpush.bf16.msra.mxu0 %v808_v4  ;;  %559 = vmatpush.bf16.msra.mxu3 %v832_v11 }
  0x2b   :  { %531 = vmatpush.bf16.msra.mxu1 %v816_v5 }
  0x2d   :  { %546 = vmatpush.bf16.msra.mxu2 %v823_v14 }
  0x2e   :  { %518 = vmatpush.bf16.msra.mxu0 %v807_v8  ;;  %560 = vmatpush.bf16.msra.mxu3 %v831_v15 }
  0x2f   :  { %532 = vmatpush.bf16.msra.mxu1 %v815_v9 }
  0x31   :  { %547 = vmatpush.bf16.msra.mxu2 %v822_v16 }
  0x32   :  { %519 = vmatpush.bf16.msra.mxu0 %v806_v12  ;;  %561 = vmatpush.bf16.msra.mxu3 %v830_v17 }
  0x33   :  { %533 = vmatpush.bf16.msra.mxu1 %v814_v13 }
  0x88   :  { %v90_v18 = vpop.f32.mrf.mxu0 }
  0x89   :  { %v103_v19 = vpop.f32.mrf.mxu1 }
  0x8a   :  { %v228_v25 = vpack.c.bf16 %v103_v19, %v90_v18 }
  0x8c   :  { %v304_v30 = vunpack.c.l.b16 %v228_v25  ;;  %v305_v31 = vunpack.c.h.b16 %v228_v25 }
  0x8f   :  { %v116_v20 = vpop.f32.mrf.mxu2 }
  0x90   :  { %v129_v21 = vpop.f32.mrf.mxu3  ;;  %v92_v22 = vpop.f32.mrf.mxu0 }
  0x91   :  { %v105_v23 = vpop.f32.mrf.mxu1  ;;  %v229_v36 = vpack.c.bf16 %v129_v21, %v116_v20 }
  0x93   :  { %v306_v42 = vunpack.c.l.b16 %v229_v36  ;;  %v307_v43 = vunpack.c.h.b16 %v229_v36 }
  0x97   :  { %v118_v24 = vpop.f32.mrf.mxu2 }
  0x98   :  { %v131_v26 = vpop.f32.mrf.mxu3  ;;  %v185_v27 = vpop.f32.mrf.mxu0 }
  0x99   :  { %v198_v28 = vpop.f32.mrf.mxu1 }
  0x9a   :  { %v230_v29 = vpack.c.bf16 %v198_v28, %v185_v27 }
  0x9c   :  { %v308_v32 = vunpack.c.l.b16 %v230_v29  ;;  %v309_v33 = vunpack.c.h.b16 %v230_v29 }
  0x9e   :  { %v312_v34 = vpack.c.b16 %v308_v32, %v304_v30  ;;  %v313_v35 = vpack.c.b16 %v309_v33, %v305_v31 }
  0x9f   :  { %v211_v37 = vpop.f32.mrf.mxu2 }
  0xa0   :  { %v224_v38 = vpop.f32.mrf.mxu3  ;;  %520 = vmatmul.bf16.vlgmr.msra.gmra.mxu0 %v312_v34  ;;  %534 = vmatmul.bf16.vlgmr.msra.gmra.mxu1 %v313_v35  ;;  %v187_v39 = vpop.f32.mrf.mxu0 }
  0xa1   :  { %v231_v40 = vpack.c.bf16 %v224_v38, %v211_v37  ;;  %v200_v41 = vpop.f32.mrf.mxu1 }
  0xa3   :  { %v310_v44 = vunpack.c.l.b16 %v231_v40  ;;  %v311_v45 = vunpack.c.h.b16 %v231_v40 }
  0xa5   :  { %v314_v46 = vpack.c.b16 %v310_v44, %v306_v42  ;;  %v315_v47 = vpack.c.b16 %v311_v45, %v307_v43 }
  0xa7   :  { %548 = vmatmul.bf16.vlgmr.msra.gmra.mxu2 %v314_v46  ;;  %562 = vmatmul.bf16.vlgmr.msra.gmra.mxu3 %v315_v47  ;;  %v213_v48 = vpop.f32.mrf.mxu2 }
  0xa8   :  { %v226_v49 = vpop.f32.mrf.mxu3 }
 0x11d   :  { %v521_v50 = vpop.f32.mrf.mxu0  ;;  %v535_v53 = vpop.f32.mrf.mxu1 }
 0x11e   :  { %v522_v52 = vadd.f32 %v841_v51, %v521_v50 }
 0x120   :  { %v536_v54 = vadd.f32 %v535_v53, %v522_v52 }
 0x125   :  { %v523_v55 = vpop.f32.mrf.mxu0  ;;  %v537_v62 = vpop.f32.mrf.mxu1 }
 0x126   :  { %v524_v59 = vadd.f32 %v841_v51, %v523_v55 }
 0x128   :  { %v538_v63 = vadd.f32 %v537_v62, %v524_v59 }
 0x12a   :  { %v549_v56 = vpop.f32.mrf.mxu2  ;;  %v563_v57 = vpop.f32.mrf.mxu3 }
 0x12b   :  { %v550_v58 = vadd.f32 %v549_v56, %v536_v54 }
 0x12d   :  { %v564_v60 = vadd.f32 %v563_v57, %v550_v58 }
 0x12f   :  { %v568_v61 = vmax.f32 %v564_v60, 0.0 }
 0x131   :  { %570 = vst.msk [vmem:[#allocation2] sm:$0xff] %vm77_vm0, %v568_v61 }
 0x132   :  { %v551_v0 = vpop.f32.mrf.mxu2  ;;  %v565_v2 = vpop.f32.mrf.mxu3 }
 0x133   :  { %v552_v1 = vadd.f32 %v551_v0, %v538_v63 }
 0x135   :  { %v566_v3 = vadd.f32 %v565_v2, %v552_v1 }
 0x137   :  { %v569_v4 = vmax.f32 %v566_v3, 0.0 }
 0x139   :  { %571 = vst.msk [vmem:[#allocation2 + $0x8] sm:$0xff] %vm77_vm0, %v569_v4 }
 0x13a   :  { %584 = dma.vmem_to_hbm [thread:$0]  %s577_s14, 256, %s579_s16, [#allocation3], %s869_s17, %s869_s17, %s870_s18  }
 0x13b   :  { %866 = dma.done.wait [#allocation3], 256  }
 0x13c   :  { %867 = vsyncadd [#allocation3], 4294967040 }
 0x13d   :  { %589 = vsyncpa [#allocation3], 1 }

</bundles_post_ra>
